<compile_context>
chip_gen: v7x
topology: tpu7x:2x2x1
jax: 0.10.0
libtpu: 0.0.40
codegen_flags: <defaults>
</compile_context>

<pallas_src>
import math
import functools

import jax
import jax.numpy as jnp
from jax import lax
from jax.experimental import pallas as pl
from jax.experimental.pallas import tpu as pltpu


# ----------------------------------------------------------------------------
# small helpers
# ----------------------------------------------------------------------------
def _round_up(a, b):
    return (a + b - 1) // b * b


def _spatial_tiling(HW, lanes, max_row_tile):
    """Flatten H*W to (rows, lanes) with lanes a 128-multiple; tile rows."""
    HWp = _round_up(HW, lanes)
    rows = HWp // lanes
    if rows <= max_row_tile:
        row_tile = rows                       # block == full dim -> always legal
    else:
        row_tile = max_row_tile               # multiple of 8
        rows = _round_up(rows, row_tile)
        HWp = rows * lanes
    return rows, row_tile, rows // row_tile, HWp


def gaussian_radius(det_size, min_overlap=0.7):
    # TODO(synk): `basic.gaussian_radius` source not provided; using the
    # standard CenterNet formula (min of three quadratic roots).
    height, width = det_size
    a1 = 1.0
    b1 = height + width
    c1 = width * height * (1.0 - min_overlap) / (1.0 + min_overlap)
    sq1 = math.sqrt(b1 * b1 - 4.0 * a1 * c1)
    r1 = (b1 + sq1) / 2.0

    a2 = 4.0
    b2 = 2.0 * (height + width)
    c2 = (1.0 - min_overlap) * width * height
    sq2 = math.sqrt(b2 * b2 - 4.0 * a2 * c2)
    r2 = (b2 + sq2) / 2.0

    a3 = 4.0 * min_overlap
    b3 = -2.0 * min_overlap * (height + width)
    c3 = (min_overlap - 1.0) * width * height
    sq3 = math.sqrt(b3 * b3 - 4.0 * a3 * c3)
    r3 = (b3 + sq3) / 2.0
    return min(r1, r2, r3)


# ----------------------------------------------------------------------------
# Kernel A (fused): centermask gaussian target + objectness + channel concat
#
#   target[b, c] = max_k vis[b,c,k] * thr( exp(-0.5*((y-ky)^2+(x-kx)^2)/r^2) )
#   out[b]       = concat([1 - max_c target[b, c], target[b]], axis=channel)
#
# Spatial is flattened row-major to (rows, 128) so the output last dim is
# lane-dense.  Grid = (B, spatial_tiles); keypoints are prefetched into SMEM.
# ----------------------------------------------------------------------------
def _heatmap_target_kernel(kpts_ref, vis_ref, out_ref, acc_ref, *,
                           C, K, W, row_tile, lanes, radius):
    b = pl.program_id(0)
    t = pl.program_id(1)

    # Flattened spatial coordinates covered by this tile (row-major over (H, W)).
    row_i = lax.broadcasted_iota(jnp.float32, (row_tile, lanes), 0)
    lane_i = lax.broadcasted_iota(jnp.float32, (row_tile, lanes), 1)
    row0 = (t * row_tile).astype(jnp.float32)
    flat = (row_i + row0) * float(lanes) + lane_i
    y_grid = jnp.floor(flat / float(W))
    x_grid = flat - y_grid * float(W)
    inv_r2 = 1.0 / (radius * radius)

    obj = jnp.zeros((row_tile, lanes), jnp.float32)
    # C and K are small static constants -> full unroll gives the LLO scheduler
    # visibility to interleave the EUP exp with the VPU sub/square/max chain.
    for c in range(C):
        acc_ref[...] = jnp.zeros((row_tile, lanes), jnp.float32)
        base = (b * C + c) * K
        for k in range(K):
            idx = base + k
            vis = vis_ref[idx]

            # Skip the whole exp + accumulate for invisible keypoints.
            @pl.when(vis > 0)
            def _(idx=idx):
                kx = kpts_ref[2 * idx].astype(jnp.float32)
                ky = kpts_ref[2 * idx + 1].astype(jnp.float32)
                dist = ((y_grid - ky) ** 2 + (x_grid - kx) ** 2) * inv_r2
                g = jnp.exp(-0.5 * dist)            # == sqrt(exp(-dist))
                g = jnp.where(g >= 0.01, g, 0.0)    # mask[mask < 0.01] = 0
                acc_ref[...] = jnp.maximum(acc_ref[...], g)

        tgt = acc_ref[...]
        out_ref[0, c + 1, :, :] = tgt
        obj = jnp.maximum(obj, tgt)

    out_ref[0, 0, :, :] = 1.0 - obj
    # TODO(synk): for large heatmaps with small radii, restrict each gaussian to
    # its ~3*radius support window instead of evaluating over the full tile.


def heatmap_target_pallas(kpts_xy, kpts_visible, radius, imgsz_HW,
                          lanes=128, max_row_tile=256):
    H, W = imgsz_HW
    B, C, K, _ = kpts_xy.shape
    HW = H * W
    rows, row_tile, n_tiles, HWp = _spatial_tiling(HW, lanes, max_row_tile)

    # 1-D SMEM-friendly scalar-prefetch layout.
    kpts_i32 = jnp.round(kpts_xy).astype(jnp.int32).reshape(-1)   # (B*C*K*2,)
    vis_i32 = (kpts_visible > 0).astype(jnp.int32).reshape(-1)    # (B*C*K,)

    kernel = functools.partial(
        _heatmap_target_kernel, C=C, K=K, W=W,
        row_tile=row_tile, lanes=lanes, radius=float(radius))

    out = pl.pallas_call(
        kernel,
        out_shape=jax.ShapeDtypeStruct((B, C + 1, rows, lanes), jnp.float32),
        grid_spec=pltpu.PrefetchScalarGridSpec(
            num_scalar_prefetch=2,            # keypoints & visibility in SMEM
            grid=(B, n_tiles),
            in_specs=[],
            out_specs=pl.BlockSpec((1, C + 1, row_tile, lanes),
                                   lambda b, t, kpts, vis: (b, 0, t, 0)),
            scratch_shapes=[pltpu.VMEM((row_tile, lanes), jnp.float32)],
        ),
        compiler_params=pltpu.CompilerParams(
            dimension_semantics=("parallel", "parallel")),
    )(kpts_i32, vis_i32)

    out = out.reshape(B, C + 1, rows * lanes)
    if rows * lanes != HW:
        out = out[:, :, :HW]
    return out.reshape(B, C + 1, H, W)


# ----------------------------------------------------------------------------
# Kernel B: objectness + concat for task == 'mask' (target provided directly).
# Same lane-dense (rows, 128) spatial layout.
# ----------------------------------------------------------------------------
def _objectness_concat_kernel(t_ref, o_ref):
    t = t_ref[0]                                  # (C, row_tile, lanes)
    o_ref[0, 0, :, :] = 1.0 - jnp.max(t, axis=0)  # torch.max(dim=1, keepdim=True)
    o_ref[0, 1:, :, :] = t


def objectness_concat_pallas(target, lanes=128, max_row_tile=256):
    B, C, H, W = target.shape
    HW = H * W
    rows, row_tile, n_tiles, HWp = _spatial_tiling(HW, lanes, max_row_tile)

    flat = target.astype(jnp.float32).reshape(B, C, HW)
    if HWp != HW:
        flat = jnp.pad(flat, ((0, 0), (0, 0), (0, HWp - HW)))
    t4 = flat.reshape(B, C, rows, lanes)

    out = pl.pallas_call(
        _objectness_concat_kernel,
        out_shape=jax.ShapeDtypeStruct((B, C + 1, rows, lanes), jnp.float32),
        grid=(B, n_tiles),
        in_specs=[pl.BlockSpec((1, C, row_tile, lanes),
                               lambda b, t: (b, 0, t, 0))],
        out_specs=pl.BlockSpec((1, C + 1, row_tile, lanes),
                               lambda b, t: (b, 0, t, 0)),
        compiler_params=pltpu.CompilerParams(
            dimension_semantics=("parallel", "parallel")),
    )(t4)

    out = out.reshape(B, C + 1, rows * lanes)
    if HWp != HW:
        out = out[:, :, :HW]
    return out.reshape(B, C + 1, H, W)


# ----------------------------------------------------------------------------
# Kernel C: export path — elementwise sigmoid, flat lane-dense 2-D tiling.
# ----------------------------------------------------------------------------
def _sigmoid_kernel(x_ref, o_ref):
    x = x_ref[...].astype(jnp.float32)
    # Numerically stable logistic; the divide runs as an EUP reciprocal.
    z = jnp.exp(-jnp.abs(x))
    inv = pl.reciprocal(1.0 + z, approx=True)
    o_ref[...] = jnp.where(x >= 0.0, inv, z * inv).astype(o_ref.dtype)


def sigmoid_pallas(x, lanes=256, max_block_rows=512):
    shape = x.shape
    total = math.prod(shape)
    flat = x.reshape(-1)

    padded = _round_up(total, lanes * 8)
    rows = padded // lanes
    block_rows = rows if rows <= max_block_rows else max_block_rows
    if rows % block_rows != 0:
        rows = _round_up(rows, block_rows)
        padded = rows * lanes
    if padded != total:
        flat = jnp.pad(flat, (0, padded - total))
    x2 = flat.reshape(rows, lanes)

    out = pl.pallas_call(
        _sigmoid_kernel,
        out_shape=jax.ShapeDtypeStruct((rows, lanes), x.dtype),
        grid=(rows // block_rows,),
        in_specs=[pl.BlockSpec((block_rows, lanes), lambda i: (i, 0))],
        out_specs=pl.BlockSpec((block_rows, lanes), lambda i: (i, 0)),
        compiler_params=pltpu.CompilerParams(
            dimension_semantics=("parallel",)),
    )(x2)

    out = out.reshape(-1)
    if padded != total:
        out = out[:total]
    return out.reshape(shape)


# ----------------------------------------------------------------------------
# HEATMAP forward (preproc/backbone/neck/head == Identity => heatmap == image)
# ----------------------------------------------------------------------------
def heatmap_forward(image, mask=None, kpts_xy=None, kpts_visible=None, task="kpts"):
    B, C, H, W = image.shape
    heatmap = image  # Identity preproc/backbone/neck/head

    outputs = {}
    # export branch: outputs = heatmap.sigmoid()
    outputs["heatmap_sigmoid"] = sigmoid_pallas(heatmap)

    # train / eval branch: build the heatmap target
    if task == "kpts":
        assert kpts_xy is not None and kpts_visible is not None
        radius = gaussian_radius((H, W))
        outputs["heatmap_target"] = heatmap_target_pallas(
            kpts_xy, kpts_visible, radius, (H, W))
    elif task == "mask":
        assert mask is not None
        outputs["heatmap_target"] = objectness_concat_pallas(mask)
    # TODO(synk): losses (BCE/Focal/Balance/Dice + UncertaintyLoss) and the
    # Similarity/IOU metrics are not defined in the provided source; those
    # branches are intentionally not reproduced.
    return outputs


# ----------------------------------------------------------------------------
# pure-JAX reference for self-checking
# ----------------------------------------------------------------------------
def _target_ref(kpts_xy, vis, radius, H, W):
    kpts = jnp.round(kpts_xy)
    y = jnp.arange(H, dtype=jnp.float32)[:, None]
    x = jnp.arange(W, dtype=jnp.float32)[None, :]
    kx = kpts[..., 0][..., None, None]
    ky = kpts[..., 1][..., None, None]
    dist = ((y - ky) ** 2 + (x - kx) ** 2) / (radius ** 2)
    g = jnp.sqrt(jnp.exp(-dist))
    g = jnp.where(g < 0.01, 0.0, g)
    g = jnp.where(vis[..., None, None] > 0, g, 0.0)
    tgt = jnp.max(g, axis=2)                       # (B, C, H, W)
    obj = jnp.max(tgt, axis=1, keepdims=True)
    return jnp.concatenate([1.0 - obj, tgt], axis=1)


# ----------------------------------------------------------------------------
if __name__ == "__main__":
    key = jax.random.PRNGKey(0)
    B, C, H, W = 2, 4, 16, 16
    K = 8  # keypoints per channel

    k1, k2, k3 = jax.random.split(key, 3)
    image = jax.random.normal(k1, (B, C, H, W), jnp.float32)
    kpts_xy = jax.random.uniform(k2, (B, C, K, 2), jnp.float32, 0.0, float(W - 1))
    kpts_visible = (jax.random.uniform(k3, (B, C, K)) > 0.4).astype(jnp.float32)

    out = heatmap_forward(image, kpts_xy=kpts_xy, kpts_visible=kpts_visible,
                          task="kpts")
    out = jax.tree_util.tree_map(jax.block_until_ready, out)

    assert out["heatmap_sigmoid"].shape == (B, C, H, W)
    assert out["heatmap_target"].shape == (B, C + 1, H, W)

    # correctness checks against pure-JAX references
    sig_ref = jax.nn.sigmoid(image)
    assert float(jnp.max(jnp.abs(out["heatmap_sigmoid"] - sig_ref))) < 1e-2

    radius = gaussian_radius((H, W))
    tgt_ref = _target_ref(kpts_xy, kpts_visible, radius, H, W)
    assert float(jnp.max(jnp.abs(out["heatmap_target"] - tgt_ref))) < 1e-4

    print("KERNEL_OK")
</pallas_src>

<mosaic_0001>
module attributes {stable_mosaic.version = 11 : i64} {
  func.func @_sigmoid_kernel(%arg0: i32, %arg1: memref<8x256xf32, #tpu.memory_space<vmem>>, %arg2: memref<8x256xf32, #tpu.memory_space<vmem>>) attributes {dimension_semantics = [#tpu.dimension_semantics<parallel>], iteration_bounds = array<i64: 1>, scalar_prefetch = 0 : i64, scratch_operands = 0 : i64, tpu.core_type = #tpu.core_type<tc>, window_params = [{transform_indices = @transform_0, window_bounds = array<i64: 8, 256>}, {transform_indices = @transform_1, window_bounds = array<i64: 8, 256>}]} {
    %c0 = arith.constant 0 : index
    %c0_0 = arith.constant 0 : index
    %0 = vector.load %arg1[%c0, %c0_0] : memref<8x256xf32, #tpu.memory_space<vmem>>, vector<8x256xf32>
    %1 = math.absf %0 : vector<8x256xf32>
    %cst = arith.constant 0.000000e+00 : f32
    %2 = vector.broadcast %cst : f32 to vector<8x256xf32>
    %3 = arith.subf %2, %1 : vector<8x256xf32>
    %4 = math.exp %3 : vector<8x256xf32>
    %cst_1 = arith.constant 1.000000e+00 : f32
    %5 = vector.broadcast %cst_1 : f32 to vector<8x256xf32>
    %6 = arith.addf %5, %4 : vector<8x256xf32>
    %7 = tpu.reciprocal %6 {approx = true} : vector<8x256xf32> -> vector<8x256xf32>
    %cst_2 = arith.constant 0.000000e+00 : f32
    %8 = vector.broadcast %cst_2 : f32 to vector<8x256xf32>
    %9 = arith.cmpf oge, %0, %8 : vector<8x256xf32>
    %10 = arith.mulf %4, %7 : vector<8x256xf32>
    %11 = arith.select %9, %7, %10 : vector<8x256xi1>, vector<8x256xf32>
    %c0_3 = arith.constant 0 : index
    %c0_4 = arith.constant 0 : index
    %12 = vector.load %arg2[%c0_3, %c0_4] : memref<8x256xf32, #tpu.memory_space<vmem>>, vector<8x256xf32>
    tpu.vector_store %arg2[%c0_3, %c0_4], %11 {strides = array<i32>} : memref<8x256xf32, #tpu.memory_space<vmem>>, vector<8x256xf32>,
    return
  }
  func.func @transform_0(%arg0: i32) -> (i32, i32) {
    %c0_i32 = arith.constant 0 : i32
    %c0_i32_0 = arith.constant 0 : i32
    return %arg0, %c0_i32 : i32, i32
  }
  func.func @transform_1(%arg0: i32) -> (i32, i32) {
    %c0_i32 = arith.constant 0 : i32
    %c0_i32_0 = arith.constant 0 : i32
    return %arg0, %c0_i32 : i32, i32
  }
}

</mosaic_0001>

<bundles_post_ra>
// kernel: tpu_custom_call.1
= control target key start
LH: loop header
LB: loop body
LE: loop exit
PB: predicated region body
PF: predicated region fallthrough
CT: control target
= control target key end

     0   :  { %6 = vsyncpa [#allocation3], 0  ;;  %s152_s0 = inlined_call_operand.hbm [shape: f32[8,256], index: 0, kind: input, shape index: {}]   ;;  %s153_s1 = inlined_call_operand.hbm [shape: f32[8,256], index: 1, kind: output, shape index: {}]  }
   0x1   :  { %7 = vsyncpa [#allocation4], 0  ;;  %s116_s6 = smov [#allocation2]   ;;  %s68_s10 = scalar_lea.hbm %s152_s0, 256 }
   0x2   :  { %s14_s7 = sshll.u32 %s116_s6, 4  ;;  %p69_p0 = scmp.ne.s32.totalorder %s152_s0, %s68_s10  ;;  %s15_s7 = int_to_ptr.vmem [resolvable:$true] %s14_s7 }
   0x3   :  { %p72_p1 = scmp.lt.u32.totalorder %s68_s10, %s152_s0 }
   0x5   :  { %p74_p2 = pnand %p72_p1, %p69_p0 }
   0x7   :  { %77 = shalt.err (!%p74_p2)
}
   0x8   :  { %s78_s15 = scalar_lea.vmem %s15_s7, 256  ;;  %p83_p4 = scmp.lt.s32.totalorder %s15_s7, %s15_s7 }
   0x9   :  { %p79_p3 = scmp.ne.s32.totalorder %s15_s7, %s78_s15  ;;  %p84_p5 = scmp.lt.s32.totalorder %s78_s15, %s78_s15 }
   0xb   :  { %p85_p6 = por %p84_p5, %p83_p4 }
   0xd   :  { %p86_p7 = pnand %p85_p6, %p79_p3 }
   0xf   :  { %89 = shalt.err (!%p86_p7)
}
  0x10   :  { %17 = dma.hbm_to_vmem [thread:$0]  %s152_s0, 256, %s15_s7, [#allocation3]  }
  0x11   :  { %112 = dma.done.wait [#allocation3], 256  }
  0x12   :  { %113 = vsyncadd [#allocation3], 4294967040  ;;  %v21_v0 = vld [vmem:[#allocation2] sm:$0xff]  ;;  %v22_v1 = vld [vmem:[#allocation2 + $0x8] sm:$0xff]  ;;  %s117_s0 = smov [#allocation5]  }
  0x13   :  { %v23_v2 = vand.u32 2147483647, %v21_v0  ;;  %v24_v3 = vand.u32 2147483647, %v22_v1  ;;  %vm35_vm0 = vcmp.ge.f32.partialorder %v21_v0, 0.0  ;;  %s49_s18 = sshll.u32 %s117_s0, 4  ;;  %s50_s18 = int_to_ptr.vmem [resolvable:$true] %s49_s18 }
  0x14   :  { %vm36_vm1 = vcmp.ge.f32.partialorder %v22_v1, 0.0  ;;  %s90_s19 = scalar_lea.vmem %s50_s18, 256  ;;  %p95_p9 = scmp.lt.s32.totalorder %s50_s18, %s50_s18 }
  0x15   :  { %v25_v4 = vsub.f32 0.0, %v23_v2  ;;  %v26_v5 = vsub.f32 0.0, %v24_v3  ;;  %p91_p8 = scmp.ne.s32.totalorder %s50_s18, %s90_s19  ;;  %p96_p10 = scmp.lt.s32.totalorder %s90_s19, %s90_s19 }
  0x17   :  { %v27_v6 = vmul.f32 1.442695, %v25_v4  ;;  %v29_v7 = vmul.f32 1.442695, %v26_v5  ;;  %p97_p11 = por %p96_p10, %p95_p9 }
  0x19   :  { %60 = vpow2.f32 %v27_v6  ;;  %p98_p12 = pnand %p97_p11, %p91_p8 }
  0x1a   :  { %62 = vpow2.f32 %v29_v7 }
  0x23   :  { %v61_v8 = vpop.eup %60 }
  0x24   :  { %v63_v9 = vpop.eup %62  ;;  %v31_v10 = vadd.f32 1.0, %v61_v8 }
  0x25   :  { %v32_v11 = vadd.f32 1.0, %v63_v9 }
  0x26   :  { %64 = vrcp.f32 %v31_v10 }
  0x27   :  { %66 = vrcp.f32 %v32_v11 }
  0x30   :  { %v65_v12 = vpop.eup %64 }
  0x31   :  { %v67_v13 = vpop.eup %66  ;;  %v37_v14 = vmul.f32 %v65_v12, %v61_v8 }
  0x32   :  { %v38_v15 = vmul.f32 %v67_v13, %v63_v9 }
  0x33   :  { %v39_v16 = vsel %vm35_vm0, %v65_v12, %v37_v14 }
  0x34   :  { %41 = vst [vmem:[#allocation5] sm:$0xff] %v39_v16  ;;  %v40_v17 = vsel %vm36_vm1, %v67_v13, %v38_v15 }
  0x35   :  { %42 = vst [vmem:[#allocation5 + $0x8] sm:$0xff] %v40_v17 }
  0x36   :  { %101 = shalt.err (!%p98_p12)
}
  0x37   :  { %s102_s22 = scalar_lea.hbm %s153_s1, 256 }
  0x38   :  { %p103_p13 = scmp.ne.s32.totalorder %s153_s1, %s102_s22  ;;  %p106_p0 = scmp.lt.u32.totalorder %s102_s22, %s153_s1 }
  0x3a   :  { %p108_p1 = pnand %p106_p0, %p103_p13 }
  0x3c   :  { %111 = shalt.err (!%p108_p1)
}
  0x3d   :  { %52 = dma.vmem_to_hbm [thread:$0]  %s50_s18, 256, %s153_s1, [#allocation4]  }
  0x3e   :  { %114 = dma.done.wait [#allocation4], 256  }
  0x3f   :  { %115 = vsyncadd [#allocation4], 4294967040 }
  0x40   :  { %56 = vsyncpa [#allocation3], 1 }
  0x41   :  { %57 = vsyncpa [#allocation4], 1 }

</bundles_post_ra>
